<compile_context>
chip_gen: v7x
topology: tpu7x:2x2x1
jax: 0.10.0
libtpu: 0.0.40
codegen_flags: <defaults>
</compile_context>

<pallas_src>
import functools

import jax
import jax.numpy as jnp
from jax import lax
from jax.experimental import pallas as pl
from jax.experimental.pallas import tpu as pltpu


def attention_kernel(x_ref, wqkv_ref, wproj_ref, o_ref, *, num_heads):
    # x_ref: (N, C) f32 block (batch dim squeezed by the BlockSpec).
    # wqkv_ref: (C, 3C) bf16, Q third pre-scaled by sqrt(head_dim) in the wrapper.
    # wproj_ref: (C, C) bf16.
    N, C = x_ref.shape
    D = C // num_heads

    # Fused QKV projection: bf16 MXU operands, f32 accumulation.
    x_bf = x_ref[...].astype(jnp.bfloat16)
    qkv = jnp.dot(x_bf, wqkv_ref[...], preferred_element_type=jnp.float32)   # (N, 3C) f32

    # Per-head attention using static lane slices -- no head transposes / relayouts.
    # Small static Python loop (fully unrolled; head count is tiny and slices stay static).
    ctx_parts = []
    for h in range(num_heads):
        q_h = qkv[:, 0 * C + h * D:0 * C + (h + 1) * D].astype(jnp.bfloat16)   # (N, D)
        k_h = qkv[:, 1 * C + h * D:1 * C + (h + 1) * D].astype(jnp.bfloat16)   # (N, D)
        v_h = qkv[:, 2 * C + h * D:2 * C + (h + 1) * D].astype(jnp.bfloat16)   # (N, D)

        # scores = (scale * q) @ k^T   (scale already folded into the Q weight)
        s = lax.dot_general(q_h, k_h, (((1,), (1,)), ((), ())),
                            preferred_element_type=jnp.float32)                # (N, N) f32

        # numerically stable softmax, kept in f32 (VPU / EUP)
        s = s - jnp.max(s, axis=-1, keepdims=True)
        p = jnp.exp(s)
        p = p * pl.reciprocal(jnp.sum(p, axis=-1, keepdims=True), approx=True)

        # context_h = attn @ v   (bf16 probs into the MXU, f32 accumulation)
        ctx_parts.append(
            jnp.dot(p.astype(jnp.bfloat16), v_h, preferred_element_type=jnp.float32))

    # Merge heads back by lane concatenation (cheap vs. a full (H,N,D)->(N,C) relayout).
    ctx = jnp.concatenate(ctx_parts, axis=-1).astype(jnp.bfloat16)             # (N, C)

    # Output projection.
    out = jnp.dot(ctx, wproj_ref[...], preferred_element_type=jnp.float32)     # (N, C)
    o_ref[...] = out.astype(o_ref.dtype)


def attention_pallas(x, w_qkv_t, w_proj_t, num_heads):
    B, N, C = x.shape
    D = C // num_heads
    scale = float(D) ** 0.5  # mirrors `qk_scale or head_dim ** 0.5` (multiplies logits)

    # Fold the softmax scale into the Q third of the weight, and ship weights as bf16
    # (halves weight DMA bytes + VMEM footprint, native MXU dtype).
    w_qkv_scaled = w_qkv_t.at[:, :C].multiply(scale).astype(jnp.bfloat16)
    w_proj_bf = w_proj_t.astype(jnp.bfloat16)

    kernel = functools.partial(attention_kernel, num_heads=num_heads)

    # Advisory cost estimate: 2 projections dominate FLOPs; exp per logit.
    flops = B * (8 * N * C * C + 4 * N * N * C)
    bytes_accessed = (2 * x.size * x.dtype.itemsize          # x in + out
                      + w_qkv_scaled.size * 2                # bf16 weights
                      + w_proj_bf.size * 2)
    cost = pl.CostEstimate(flops=flops,
                           transcendentals=B * num_heads * N * N,
                           bytes_accessed=bytes_accessed)

    return pl.pallas_call(
        kernel,
        out_shape=jax.ShapeDtypeStruct((B, N, C), x.dtype),
        grid_spec=pltpu.PrefetchScalarGridSpec(
            num_scalar_prefetch=0,
            grid=(B,),
            in_specs=[
                # Leading unit batch dim squeezed -> kernel sees lane-dense (N, C).
                pl.BlockSpec((None, N, C), lambda b: (b, 0, 0)),   # per-batch token block
                pl.BlockSpec((C, 3 * C), lambda b: (0, 0)),        # full qkv weight (bf16)
                pl.BlockSpec((C, C), lambda b: (0, 0)),            # full proj weight (bf16)
            ],
            out_specs=pl.BlockSpec((None, N, C), lambda b: (b, 0, 0)),
        ),
        compiler_params=pltpu.CompilerParams(
            dimension_semantics=("parallel",),
            vmem_limit_bytes=48 * 1024 * 1024,   # above v6e's 32 MiB scoped default, within v7x's 64 MiB physical
        ),
        cost_estimate=cost,
    )(x, w_qkv_scaled, w_proj_bf)


def attention_ref(x, w_qkv_t, w_proj_t, num_heads):
    # Pure-JAX f32 reference following the PyTorch forward line-by-line.
    B, N, C = x.shape
    D = C // num_heads
    scale = float(D) ** 0.5
    qkv = (x @ w_qkv_t).reshape(B, N, 3, num_heads, D).transpose(2, 0, 3, 1, 4)
    q, k, v = qkv[0], qkv[1], qkv[2]
    attn = jnp.einsum('bhnd,bhmd->bhnm', q, k) * scale
    attn = jax.nn.softmax(attn, axis=-1)
    out = jnp.einsum('bhnm,bhmd->bhnd', attn, v).transpose(0, 2, 1, 3).reshape(B, N, C)
    return out @ w_proj_t


if __name__ == "__main__":
    B, N, C = 2, 16, 32
    num_heads = 4   # head_dim = 8

    key = jax.random.PRNGKey(0)
    kx, kqkv, kproj = jax.random.split(key, 3)

    x = jax.random.normal(kx, (B, N, C), dtype=jnp.float32)
    # Deterministic synthetic parameters (nn.Linear shapes: qkv (3C, C), proj (C, C));
    # stored here already transposed so y = x @ W_t.
    w_qkv_t = jax.random.normal(kqkv, (C, 3 * C), dtype=jnp.float32) * 0.05
    w_proj_t = jax.random.normal(kproj, (C, C), dtype=jnp.float32) * 0.05

    out = attention_pallas(x, w_qkv_t, w_proj_t, num_heads)
    out = jax.block_until_ready(out)

    ref = attention_ref(x, w_qkv_t, w_proj_t, num_heads)
    assert out.shape == (B, N, C)
    # bf16 MXU operands -> looser tolerance than the pure-f32 version.
    assert jnp.allclose(out, ref, atol=2e-2, rtol=2e-2), "Pallas output mismatch vs reference"

    print("KERNEL_OK")
</pallas_src>

<mosaic_0001>
module attributes {stable_mosaic.version = 11 : i64} {
  func.func @attention_kernel(%arg0: i32, %arg1: memref<1x16x32xf32, #tpu.memory_space<vmem>>, %arg2: memref<32x96xbf16, #tpu.memory_space<vmem>>, %arg3: memref<32x32xbf16, #tpu.memory_space<vmem>>, %arg4: memref<1x16x32xf32, #tpu.memory_space<vmem>>) attributes {dimension_semantics = [#tpu.dimension_semantics<parallel>], iteration_bounds = array<i64: 2>, scalar_prefetch = 0 : i64, scratch_operands = 0 : i64, tpu.core_type = #tpu.core_type<tc>, window_params = [{transform_indices = @transform_0, window_bounds = array<i64: 1, 16, 32>}, {pipeline_mode = #tpu.pipeline_mode<synchronous>, transform_indices = @transform_1, window_bounds = array<i64: 32, 96>}, {pipeline_mode = #tpu.pipeline_mode<synchronous>, transform_indices = @transform_2, window_bounds = array<i64: 32, 32>}, {transform_indices = @transform_3, window_bounds = array<i64: 1, 16, 32>}]} {
    %c0 = arith.constant 0 : index
    %c0_0 = arith.constant 0 : index
    %c0_1 = arith.constant 0 : index
    %0 = vector.load %arg1[%c0, %c0_0, %c0_1] : memref<1x16x32xf32, #tpu.memory_space<vmem>>, vector<1x16x32xf32>
    %1 = vector.shape_cast %0 : vector<1x16x32xf32> to vector<16x32xf32>
    %2 = arith.truncf %1 : vector<16x32xf32> to vector<16x32xbf16>
    %c0_2 = arith.constant 0 : index
    %c0_3 = arith.constant 0 : index
    %3 = vector.load %arg2[%c0_2, %c0_3] : memref<32x96xbf16, #tpu.memory_space<vmem>>, vector<32x96xbf16>
    %cst = arith.constant dense<0.000000e+00> : vector<16x96xf32>
    %4 = tpu.matmul %2, %3, %cst {dimension_numbers = #tpu.dot_dimension_numbers<[1], [0], [0], [1], [0, 0, 1, 1], [], []>} : vector<16x32xbf16>, vector<32x96xbf16>, vector<16x96xf32> -> vector<16x96xf32>
    %5 = vector.extract_strided_slice %4 {offsets = [0, 0], sizes = [16, 8], strides = [1, 1]} : vector<16x96xf32> to vector<16x8xf32>
    %6 = arith.truncf %5 : vector<16x8xf32> to vector<16x8xbf16>
    %7 = vector.extract_strided_slice %4 {offsets = [0, 32], sizes = [16, 8], strides = [1, 1]} : vector<16x96xf32> to vector<16x8xf32>
    %8 = arith.truncf %7 : vector<16x8xf32> to vector<16x8xbf16>
    %9 = vector.extract_strided_slice %4 {offsets = [0, 64], sizes = [16, 8], strides = [1, 1]} : vector<16x96xf32> to vector<16x8xf32>
    %10 = arith.truncf %9 : vector<16x8xf32> to vector<16x8xbf16>
    %cst_4 = arith.constant dense<0.000000e+00> : vector<16x16xf32>
    %11 = tpu.matmul %6, %8, %cst_4 {dimension_numbers = #tpu.dot_dimension_numbers<[1], [1], [0], [0], [0, 0, 1, 0], [], []>} : vector<16x8xbf16>, vector<16x8xbf16>, vector<16x16xf32> -> vector<16x16xf32>
    %cst_5 = arith.constant dense<0xFF800000> : vector<16xf32>
    %12 = vector.multi_reduction <maximumf>, %11, %cst_5 [1] : vector<16x16xf32> to vector<16xf32>
    %13 = vector.shape_cast %12 : vector<16xf32> to vector<16x1xf32>
    %14 = vector.broadcast %13 : vector<16x1xf32> to vector<16x16xf32>
    %15 = arith.subf %11, %14 : vector<16x16xf32>
    %16 = math.exp %15 : vector<16x16xf32>
    %cst_6 = arith.constant dense<0.000000e+00> : vector<16xf32>
    %17 = vector.multi_reduction <add>, %16, %cst_6 [1] : vector<16x16xf32> to vector<16xf32>
    %18 = vector.shape_cast %17 : vector<16xf32> to vector<16x1xf32>
    %19 = tpu.reciprocal %18 {approx = true} : vector<16x1xf32> -> vector<16x1xf32>
    %20 = vector.broadcast %19 : vector<16x1xf32> to vector<16x16xf32>
    %21 = arith.mulf %16, %20 : vector<16x16xf32>
    %22 = arith.truncf %21 : vector<16x16xf32> to vector<16x16xbf16>
    %cst_7 = arith.constant dense<0.000000e+00> : vector<16x8xf32>
    %23 = tpu.matmul %22, %10, %cst_7 {dimension_numbers = #tpu.dot_dimension_numbers<[1], [0], [0], [1], [0, 0, 1, 1], [], []>} : vector<16x16xbf16>, vector<16x8xbf16>, vector<16x8xf32> -> vector<16x8xf32>
    %24 = vector.extract_strided_slice %4 {offsets = [0, 8], sizes = [16, 8], strides = [1, 1]} : vector<16x96xf32> to vector<16x8xf32>
    %25 = arith.truncf %24 : vector<16x8xf32> to vector<16x8xbf16>
    %26 = vector.extract_strided_slice %4 {offsets = [0, 40], sizes = [16, 8], strides = [1, 1]} : vector<16x96xf32> to vector<16x8xf32>
    %27 = arith.truncf %26 : vector<16x8xf32> to vector<16x8xbf16>
    %28 = vector.extract_strided_slice %4 {offsets = [0, 72], sizes = [16, 8], strides = [1, 1]} : vector<16x96xf32> to vector<16x8xf32>
    %29 = arith.truncf %28 : vector<16x8xf32> to vector<16x8xbf16>
    %cst_8 = arith.constant dense<0.000000e+00> : vector<16x16xf32>
    %30 = tpu.matmul %25, %27, %cst_8 {dimension_numbers = #tpu.dot_dimension_numbers<[1], [1], [0], [0], [0, 0, 1, 0], [], []>} : vector<16x8xbf16>, vector<16x8xbf16>, vector<16x16xf32> -> vector<16x16xf32>
    %cst_9 = arith.constant dense<0xFF800000> : vector<16xf32>
    %31 = vector.multi_reduction <maximumf>, %30, %cst_9 [1] : vector<16x16xf32> to vector<16xf32>
    %32 = vector.shape_cast %31 : vector<16xf32> to vector<16x1xf32>
    %33 = vector.broadcast %32 : vector<16x1xf32> to vector<16x16xf32>
    %34 = arith.subf %30, %33 : vector<16x16xf32>
    %35 = math.exp %34 : vector<16x16xf32>
    %cst_10 = arith.constant dense<0.000000e+00> : vector<16xf32>
    %36 = vector.multi_reduction <add>, %35, %cst_10 [1] : vector<16x16xf32> to vector<16xf32>
    %37 = vector.shape_cast %36 : vector<16xf32> to vector<16x1xf32>
    %38 = tpu.reciprocal %37 {approx = true} : vector<16x1xf32> -> vector<16x1xf32>
    %39 = vector.broadcast %38 : vector<16x1xf32> to vector<16x16xf32>
    %40 = arith.mulf %35, %39 : vector<16x16xf32>
    %41 = arith.truncf %40 : vector<16x16xf32> to vector<16x16xbf16>
    %cst_11 = arith.constant dense<0.000000e+00> : vector<16x8xf32>
    %42 = tpu.matmul %41, %29, %cst_11 {dimension_numbers = #tpu.dot_dimension_numbers<[1], [0], [0], [1], [0, 0, 1, 1], [], []>} : vector<16x16xbf16>, vector<16x8xbf16>, vector<16x8xf32> -> vector<16x8xf32>
    %43 = vector.extract_strided_slice %4 {offsets = [0, 16], sizes = [16, 8], strides = [1, 1]} : vector<16x96xf32> to vector<16x8xf32>
    %44 = arith.truncf %43 : vector<16x8xf32> to vector<16x8xbf16>
    %45 = vector.extract_strided_slice %4 {offsets = [0, 48], sizes = [16, 8], strides = [1, 1]} : vector<16x96xf32> to vector<16x8xf32>
    %46 = arith.truncf %45 : vector<16x8xf32> to vector<16x8xbf16>
    %47 = vector.extract_strided_slice %4 {offsets = [0, 80], sizes = [16, 8], strides = [1, 1]} : vector<16x96xf32> to vector<16x8xf32>
    %48 = arith.truncf %47 : vector<16x8xf32> to vector<16x8xbf16>
    %cst_12 = arith.constant dense<0.000000e+00> : vector<16x16xf32>
    %49 = tpu.matmul %44, %46, %cst_12 {dimension_numbers = #tpu.dot_dimension_numbers<[1], [1], [0], [0], [0, 0, 1, 0], [], []>} : vector<16x8xbf16>, vector<16x8xbf16>, vector<16x16xf32> -> vector<16x16xf32>
    %cst_13 = arith.constant dense<0xFF800000> : vector<16xf32>
    %50 = vector.multi_reduction <maximumf>, %49, %cst_13 [1] : vector<16x16xf32> to vector<16xf32>
    %51 = vector.shape_cast %50 : vector<16xf32> to vector<16x1xf32>
    %52 = vector.broadcast %51 : vector<16x1xf32> to vector<16x16xf32>
    %53 = arith.subf %49, %52 : vector<16x16xf32>
    %54 = math.exp %53 : vector<16x16xf32>
    %cst_14 = arith.constant dense<0.000000e+00> : vector<16xf32>
    %55 = vector.multi_reduction <add>, %54, %cst_14 [1] : vector<16x16xf32> to vector<16xf32>
    %56 = vector.shape_cast %55 : vector<16xf32> to vector<16x1xf32>
    %57 = tpu.reciprocal %56 {approx = true} : vector<16x1xf32> -> vector<16x1xf32>
    %58 = vector.broadcast %57 : vector<16x1xf32> to vector<16x16xf32>
    %59 = arith.mulf %54, %58 : vector<16x16xf32>
    %60 = arith.truncf %59 : vector<16x16xf32> to vector<16x16xbf16>
    %cst_15 = arith.constant dense<0.000000e+00> : vector<16x8xf32>
    %61 = tpu.matmul %60, %48, %cst_15 {dimension_numbers = #tpu.dot_dimension_numbers<[1], [0], [0], [1], [0, 0, 1, 1], [], []>} : vector<16x16xbf16>, vector<16x8xbf16>, vector<16x8xf32> -> vector<16x8xf32>
    %62 = vector.extract_strided_slice %4 {offsets = [0, 24], sizes = [16, 8], strides = [1, 1]} : vector<16x96xf32> to vector<16x8xf32>
    %63 = arith.truncf %62 : vector<16x8xf32> to vector<16x8xbf16>
    %64 = vector.extract_strided_slice %4 {offsets = [0, 56], sizes = [16, 8], strides = [1, 1]} : vector<16x96xf32> to vector<16x8xf32>
    %65 = arith.truncf %64 : vector<16x8xf32> to vector<16x8xbf16>
    %66 = vector.extract_strided_slice %4 {offsets = [0, 88], sizes = [16, 8], strides = [1, 1]} : vector<16x96xf32> to vector<16x8xf32>
    %67 = arith.truncf %66 : vector<16x8xf32> to vector<16x8xbf16>
    %cst_16 = arith.constant dense<0.000000e+00> : vector<16x16xf32>
    %68 = tpu.matmul %63, %65, %cst_16 {dimension_numbers = #tpu.dot_dimension_numbers<[1], [1], [0], [0], [0, 0, 1, 0], [], []>} : vector<16x8xbf16>, vector<16x8xbf16>, vector<16x16xf32> -> vector<16x16xf32>
    %cst_17 = arith.constant dense<0xFF800000> : vector<16xf32>
    %69 = vector.multi_reduction <maximumf>, %68, %cst_17 [1] : vector<16x16xf32> to vector<16xf32>
    %70 = vector.shape_cast %69 : vector<16xf32> to vector<16x1xf32>
    %71 = vector.broadcast %70 : vector<16x1xf32> to vector<16x16xf32>
    %72 = arith.subf %68, %71 : vector<16x16xf32>
    %73 = math.exp %72 : vector<16x16xf32>
    %cst_18 = arith.constant dense<0.000000e+00> : vector<16xf32>
    %74 = vector.multi_reduction <add>, %73, %cst_18 [1] : vector<16x16xf32> to vector<16xf32>
    %75 = vector.shape_cast %74 : vector<16xf32> to vector<16x1xf32>
    %76 = tpu.reciprocal %75 {approx = true} : vector<16x1xf32> -> vector<16x1xf32>
    %77 = vector.broadcast %76 : vector<16x1xf32> to vector<16x16xf32>
    %78 = arith.mulf %73, %77 : vector<16x16xf32>
    %79 = arith.truncf %78 : vector<16x16xf32> to vector<16x16xbf16>
    %cst_19 = arith.constant dense<0.000000e+00> : vector<16x8xf32>
    %80 = tpu.matmul %79, %67, %cst_19 {dimension_numbers = #tpu.dot_dimension_numbers<[1], [0], [0], [1], [0, 0, 1, 1], [], []>} : vector<16x16xbf16>, vector<16x8xbf16>, vector<16x8xf32> -> vector<16x8xf32>
    %81 = tpu.concatenate %23, %42, %61, %80 in 1 : vector<16x8xf32>, vector<16x8xf32>, vector<16x8xf32>, vector<16x8xf32> -> vector<16x32xf32>
    %82 = arith.truncf %81 : vector<16x32xf32> to vector<16x32xbf16>
    %c0_20 = arith.constant 0 : index
    %c0_21 = arith.constant 0 : index
    %83 = vector.load %arg3[%c0_20, %c0_21] : memref<32x32xbf16, #tpu.memory_space<vmem>>, vector<32x32xbf16>
    %cst_22 = arith.constant dense<0.000000e+00> : vector<16x32xf32>
    %84 = tpu.matmul %82, %83, %cst_22 {dimension_numbers = #tpu.dot_dimension_numbers<[1], [0], [0], [1], [0, 0, 1, 1], [], []>} : vector<16x32xbf16>, vector<32x32xbf16>, vector<16x32xf32> -> vector<16x32xf32>
    %c0_23 = arith.constant 0 : index
    %c0_24 = arith.constant 0 : index
    %c0_25 = arith.constant 0 : index
    %85 = vector.load %arg4[%c0_23, %c0_24, %c0_25] : memref<1x16x32xf32, #tpu.memory_space<vmem>>, vector<1x16x32xf32>
    %86 = vector.shape_cast %85 : vector<1x16x32xf32> to vector<16x32xf32>
    %87 = vector.shape_cast %84 : vector<16x32xf32> to vector<1x16x32xf32>
    tpu.vector_store %arg4[%c0_23, %c0_24, %c0_25], %87 {strides = array<i32>} : memref<1x16x32xf32, #tpu.memory_space<vmem>>, vector<1x16x32xf32>,
    return
  }
  func.func @transform_0(%arg0: i32) -> (i32, i32, i32) {
    %c0_i32 = arith.constant 0 : i32
    %c0_i32_0 = arith.constant 0 : i32
    %c0_i32_1 = arith.constant 0 : i32
    return %arg0, %c0_i32, %c0_i32_0 : i32, i32, i32
  }
  func.func @transform_1(%arg0: i32) -> (i32, i32) {
    %c0_i32 = arith.constant 0 : i32
    %c0_i32_0 = arith.constant 0 : i32
    %c0_i32_1 = arith.constant 0 : i32
    return %c0_i32, %c0_i32_0 : i32, i32
  }
  func.func @transform_2(%arg0: i32) -> (i32, i32) {
    %c0_i32 = arith.constant 0 : i32
    %c0_i32_0 = arith.constant 0 : i32
    %c0_i32_1 = arith.constant 0 : i32
    return %c0_i32, %c0_i32_0 : i32, i32
  }
  func.func @transform_3(%arg0: i32) -> (i32, i32, i32) {
    %c0_i32 = arith.constant 0 : i32
    %c0_i32_0 = arith.constant 0 : i32
    %c0_i32_1 = arith.constant 0 : i32
    return %arg0, %c0_i32, %c0_i32_0 : i32, i32, i32
  }
}

</mosaic_0001>

<bundles_post_ra>
// kernel: tpu_custom_call.1
= control target key start
LH: loop header
LB: loop body
LE: loop exit
PB: predicated region body
PF: predicated region fallthrough
CT: control target
= control target key end

     0   :  { %8 = vsyncpa [#allocation3], 0  ;;  %s1761_s0 = inlined_call_operand.hbm [shape: f32[2,16,32], index: 0, kind: input, shape index: {}]   ;;  %s1762_s1 = inlined_call_operand.hbm [shape: bf16[32,96], index: 1, kind: input, shape index: {}]   ;;  %s1763_s2 = inlined_call_operand.hbm [shape: bf16[32,32], index: 2, kind: input, shape index: {}]   ;;  %s1764_s3 = inlined_call_operand.hbm [shape: f32[2,16,32], index: 3, kind: output, shape index: {}]  }
   0x1   :  { %10 = vsyncpa [#allocation3 + $0x1], 0 }
   0x2   :  { %11 = vsyncpa [#allocation6], 0 }
   0x3   :  { %12 = vsyncpa [#allocation4], 0 }
   0x4   :  { %14 = vsyncpa [#allocation4 + $0x1], 0  ;;  %s1431_s12 = smov 0   ;;  %s1433_s13 = smov 0  }
   0x5   :  { %s1435_s14 = smov 0   ;;  %s1437_s15 = smov 0  }
   0x6 LB: > { %s1452_s16 = sadd.s32 4294967295, %s1384_s15   ;;  %s969_s17 = sadd.s32 4294967294, %s1384_s15   ;;  %s1384_s15 = sphi %s1437_s15, %s1784_s15   ;;  %s1380_s14 = sphi %s1435_s14, %s1783_s14   ;;  %s1376_s13 = sphi %s1433_s13, %s1782_s13   ;;  %s1372_s12 = sphi %s1431_s12, %s1781_s12  }
   0x7   : > { %p40_p0 = scmp.ne.s32.totalorder %s1376_s13, %s1372_s12  ;;  %p1765_p1 = scmp.eq.s32.totalorder %s1452_s16, 0 }
   0x8   : > { %p112_p3 = scmp.eq.s32.totalorder %s969_s17, 1  ;;  %p970_p5 = scmp.ge.s32.totalorder %s1384_s15, 1 }
   0x9   : > { %p1461_p4 = por %p1765_p1, %p40_p0  ;;  %p119_p7 = scmp.lt.s32.totalorder %s1384_s15, 3 }
   0xa   : > { %p1466_p6 = por %p112_p3, %p40_p0  ;;  %s1386_s21 = smov [#allocation5]  }
   0xb   : > { %s1768_s18 = scalar_select %p1461_p4, 1, 0 }
   0xc   : > { %s1769_s19 = scalar_select %p1466_p6, 1, 0 }
   0xd   : > { %p1471_p8 = pnand %p970_p5, %p119_p7  ;;  %s131_s22 = sshll.u32 %s1386_s21, 4  ;;  %s1475_s22 = int_to_ptr.vmem [resolvable:$true] %s131_s22 }
   0xe   : > { %s1387_s24 = smov [#allocation7]   ;;  %s1228_s28 = scalar_lea.hbm %s1762_s1, 256 }
   0xf   : > { %p1101_p9 = pneg %p1471_p8  ;;  %s144_s25 = sshll.u32 %s1387_s24, 4  ;;  %s1486_s25 = int_to_ptr.vmem [resolvable:$true] %s144_s25 }
  0x10   : > { %p1229_p12 = scmp.ne.s32.totalorder %s1762_s1, %s1228_s28  ;;  %p1235_p5 = scmp.lt.u32.totalorder %s1228_s28, %s1762_s1 }
  0x11   : > { %p1482_p11 = pnand %p1101_p9, %p1765_p1 }
  0x13   : > { %p1230_p13 = pneg %p1482_p11 }
  0x15   : > { %p1231_p0 = pnand %p1230_p13, %p1229_p12 }
  0x17   : > { %p1232_p3 = pneg %p1231_p0 }
  0x19   : > { %p1237_p7 = pnand %p1235_p5, %p1232_p3 }
  0x1b   : > { %1240 = shalt.err (!%p1237_p7)
}
  0x1c   : > { %s1241_s6 = scalar_lea.vmem %s1475_s22, 256  ;;  %p1249_p2 = scmp.lt.s32.totalorder %s1475_s22, %s1475_s22 }
  0x1d   : > { %p1242_p9 = scmp.ne.s32.totalorder %s1475_s22, %s1241_s6  ;;  %p1250_p12 = scmp.lt.s32.totalorder %s1241_s6, %s1241_s6 }
  0x1f   : > { %p1244_p10 = pnand %p1242_p9, %p1230_p13  ;;  %p1251_p0 = por %p1250_p12, %p1249_p2 }
  0x21   : > { %p1245_p1 = pneg %p1244_p10 }
  0x23   : > { %p1252_p6 = pnand %p1251_p0, %p1245_p1 }
  0x25   : > { %1255 = shalt.err (!%p1252_p6)
}
  0x26   : > { %s1388_s7 = smov 64   ;;  %s1389_s8 = smov 4  }
  0x27   : > { %1104 = dma.hbm_to_vmem [thread:$0]  (!%p1482_p11), %s1762_s1, 256, %s1475_s22, [#allocation6], %s1388_s7, %s1388_s7, %s1389_s8  }
  0x28   : > { %s1256_s21 = scalar_lea.hbm %s1763_s2, 256 }
  0x29   : > { %p1257_p2 = scmp.ne.s32.totalorder %s1763_s2, %s1256_s21  ;;  %p1263_p10 = scmp.lt.u32.totalorder %s1256_s21, %s1763_s2 }
  0x2b   : > { %p1259_p1 = pnand %p1257_p2, %p1230_p13 }
  0x2d   : > { %p1260_p6 = pneg %p1259_p1 }
  0x2f   : > { %p1265_p3 = pnand %p1263_p10, %p1260_p6 }
  0x31   : > { %1268 = shalt.err (!%p1265_p3)
}
  0x32   : > { %s1269_s22 = scalar_lea.vmem %s1486_s25, 256  ;;  %p1277_p12 = scmp.lt.s32.totalorder %s1486_s25, %s1486_s25 }
  0x33   : > { %p1270_p5 = scmp.ne.s32.totalorder %s1486_s25, %s1269_s22  ;;  %p1278_p0 = scmp.lt.s32.totalorder %s1269_s22, %s1269_s22 }
  0x35   : > { %p1272_p7 = pnand %p1270_p5, %p1230_p13  ;;  %p1279_p2 = por %p1278_p0, %p1277_p12 }
  0x37   : > { %p1273_p9 = pneg %p1272_p7 }
  0x39   : > { %p1280_p1 = pnand %p1279_p2, %p1273_p9 }
  0x3b   : > { %1283 = shalt.err (!%p1280_p1)
}
  0x3c   : > { %1107 = dma.hbm_to_vmem [thread:$0]  (!%p1482_p11), %s1763_s2, 256, %s1486_s25, [#allocation6], %s1388_s7, %s1388_s7, %s1389_s8  }
  0x3d   : > { %s1541_s4 = sadd.s32 1, %s1384_s15   ;;  %s27_s23 = sadd.s32 1, %s1380_s14 }
  0x3e   : > { %s24_s5 = ssub.s32 %s1384_s15, %s1541_s4  ;;  %p34_p13 = scmp.ne.s32.totalorder %s1380_s14, %s1376_s13 }
  0x3f   : > { %p25_p6 = scmp.eq.s32.totalorder %s24_s5, 0  ;;  %p35_p10 = scmp.eq.s32.totalorder %s1384_s15, 0 }
  0x40   : > { %p1772_p3 = scmp.eq.s32.totalorder %s1452_s16, 1  ;;  %p1118_p7 = scmp.lt.s32.totalorder %s1384_s15, 2 }
  0x41   : > { %s1557_s9 = scalar_select %p25_p6, %s1380_s14, %s27_s23  }
  0x42   : > { %p1551_p5 = por %p1772_p3, %p34_p13  ;;  %p36_p9 = por %p35_p10, %p34_p13 }
  0x43   : > { %s158_s10 = sand.u32 1, %s1380_s14   ;;  %s1001_s25 = sshll.u32 %s1384_s15, 8 }
  0x44   : > { %s1773_s6 = scalar_select %p1551_p5, 1, 0 }
  0x45   : > { %s974_s11 = sshll.u32 %s158_s10, 4  ;;  %s1564_s17 = scalar_lea.hbm %s1761_s0, %s1001_s25 }
  0x46   : > { %s162_s21 = scalar_lea.vmem [#allocation2], %s974_s11  ;;  %p1568_p11 = pnand %p1118_p7, %p36_p9 }
  0x47   : > { %s169_s24 = sshll.u32 %s162_s21, 4  ;;  %s1572_s27 = scalar_lea.sflag [#allocation3], %s158_s10  ;;  %s1566_s24 = int_to_ptr.vmem [resolvable:$true] %s169_s24 }
  0x48   : > { %s1284_s28 = scalar_lea.hbm %s1564_s17, 256  ;;  %p1286_p0 = pneg %p1568_p11 }
  0x49   : > { %p1285_p12 = scmp.ne.s32.totalorder %s1564_s17, %s1284_s28  ;;  %s1289_s30 = scalar_lea.hbm %s1761_s0, 512 }
  0x4a   : > { %p1290_p13 = scmp.lt.u32.totalorder %s1564_s17, %s1761_s0  ;;  %p1291_p6 = scmp.lt.u32.totalorder %s1289_s30, %s1284_s28 }
  0x4b   : > { %p1287_p2 = pnand %p1286_p0, %p1285_p12  ;;  %p1293_p3 = scmp.lt.u32.totalorder %s1284_s28, %s1564_s17 }
  0x4c   : > { %p1292_p10 = por %p1291_p6, %p1290_p13 }
  0x4d   : > { %p1288_p1 = pneg %p1287_p2 }
  0x4e   : > { %p1294_p7 = por %p1293_p3, %p1292_p10 }
  0x50   : > { %p1295_p9 = pnand %p1294_p7, %p1288_p1 }
  0x52   : > { %1298 = shalt.err (!%p1295_p9)
}
  0x53   : > { %s1299_s10 = scalar_lea.vmem %s1566_s24, 256  ;;  %s1390_s11 = smov [#allocation2]  }
  0x54   : > { %p1300_p12 = scmp.ne.s32.totalorder %s1566_s24, %s1299_s10  ;;  %s1304_s25 = sshll.u32 %s1390_s11, 4  ;;  %s1305_s25 = int_to_ptr.vmem [resolvable:$false] %s1304_s25 }
  0x55   : > { %s1306_s7 = scalar_lea.vmem %s1305_s25, 512  ;;  %p1307_p4 = scmp.lt.s32.totalorder %s1566_s24, %s1305_s25 }
  0x56   : > { %p1302_p2 = pnand %p1300_p12, %p1286_p0  ;;  %p1308_p13 = scmp.lt.s32.totalorder %s1306_s7, %s1299_s10 }
  0x58   : > { %p1303_p5 = pneg %p1302_p2  ;;  %p1309_p6 = por %p1308_p13, %p1307_p4 }
  0x5a   : > { %p1310_p10 = pnand %p1309_p6, %p1303_p5 }
  0x5c   : > { %1313 = shalt.err (!%p1310_p10)
}
  0x5d   : > { %s1391_s8 = smov 128   ;;  %s1392_s21 = smov 8  }
  0x5e   : > { %1111 = dma.hbm_to_vmem [thread:$0]  (!%p1568_p11), %s1564_s17, 256, %s1566_s24, %s1572_s27, %s1391_s8, %s1391_s8, %s1392_s21  }
  0x5f   : > { %181 = sbr.rel (%p1471_p8) target bundleno = 1619 (0x653), region = 32  ;;  %s1603_s28 = sand.u32 (!%p1471_p8), 1, %s1376_s13  }
  0x60   : > { %s978_s22 = sshll.u32 (!%p1471_p8), %s1603_s28, 4  ;;  %s184_s29 = scalar_lea.sflag (!%p1471_p8), [#allocation3], %s1603_s28 }
  0x61   : > { %s187_s30 = scalar_lea.vmem (!%p1471_p8), [#allocation2], %s978_s22  ;;  %p1775_p4 = scmp.ne.s32.totalorder (!%p1471_p8), %s1768_s18, 0 }
  0x66   : > { %1359 = dma.done.wait (%p1775_p4), %s184_s29, 256  }
  0x67   : > { %1361 = vsyncadd (%p1775_p4), %s184_s29, 4294967040  ;;  %p1776_p5 = scmp.eq.s32.totalorder %s1452_s16, 0 }
  0x69   : > { %1363 = dma.done.wait (%p1776_p5), [#allocation6], 512   ;;  %p1777_p8 = pmov %p1776_p5 }
  0x6a   : > { %v1393_v0 = vmov 0.0   ;;  %vm1394_vm0 = vmmov 0   ;;  %v1192_v1 = vld [vmem:[#allocation5] sm:$0xff]   ;;  %v1193_v2 = vld [vmem:[#allocation5 + $0x8] sm:$0xff]   ;;  %vm238_vm1 = vcmask 261120   ;;  %s1395_s18 = smov 120  }
  0x6b   : > { %1365 = vsyncadd (%p1777_p8), [#allocation6], 4294966784  ;;  %1025 = vmatprep.subr.bf16.mxu0 %v1393_v0  ;;  %1029 = vmatprep.mubr.msk.bf16.mxu0 %vm1394_vm0, %v1393_v0  ;;  %v219_v3 = vld [vmem:[%s187_s30] sm:$0xff]  ;;  %v220_v4 = vld [vmem:[%s187_s30 + $0x8] sm:$0xff]  ;;  %s1396_s20 = smov 96   ;;  %s1397_s17 = smov 80  }
  0x6c   : > { %1033 = vmatprep.subr.bf16.mxu1 %v1393_v0  ;;  %1035 = vmatprep.mubr.msk.bf16.mxu1 %vm1394_vm0, %v1393_v0  ;;  %v221_v5 = vpack.c.bf16 %v220_v4, %v219_v3  ;;  %s1398_s24 = smov 88   ;;  %s1399_s26 = smov 72   ;;  %vm287_vm2 = vcmask 64512   ;;  %vm335_vm3 = vcmask 130048   ;;  %vm797_vm4 = vcmask 195584  }
  0x6d   : > { %1026 = vmatpush3.bf16.msra.mxu0 %v1192_v1  ;;  %s1400_s27 = smov 112   ;;  %s1401_s23 = smov 104  }
  0x6e   : > { %1027 = vmatprep.subr.bf16.mxu0 %v1393_v0  ;;  %s1402_s5 = smov 56   ;;  %s1403_s10 = smov 64  }
  0x6f   : > { %s1404_s11 = smov 48   ;;  %s1405_s25 = smov 40  }
  0x70   : > { %s1406_s7 = smov 8   ;;  %s1407_s8 = smov 16  }
  0x71   : > { %1028 = vmatpush3.bf16.msra.mxu0 %v1193_v2  ;;  %s1408_s21 = smov 24   ;;  %s217_s29 = scalar_lea.vmem [#allocation8], %s978_s22 }
  0x72   : > { %1039 = vmatprep.subr.bf16.mxu0 %v1393_v0  ;;  %s877_s30 = sshll.u32 %s217_s29, 4  ;;  %s864_s22 = scalar_lea.sflag [#allocation4], %s1603_s28  ;;  %s1709_s30 = int_to_ptr.vmem [resolvable:$true] %s877_s30 }
  0x73   : > { %p1778_p0 = scmp.ne.s32.totalorder %s1773_s6, 0 }
  0x74   : > { %1030 = vmatmul.mubr.msk.bf16.vlgmr.msra.gmra.mrb[0].mxu0 %vm238_vm1, %v221_v5 }
  0x75   : > { %1041 = vmatprep.mubr.msk.bf16.mxu0 %vm1394_vm0, %v1393_v0 }
 0x147   : > { %v276_v6 = vpop.f32.mrb[0].mxu0 }
 0x148   : > { %v1031_v7 = vpop.f32.mrb[1].mxu0 }
 0x149   : > { %v279_v8 = vpop.f32.mrb[2].mxu0 }
 0x14a   : > { %v1628_v9 = vpack.c.bf16 %v279_v8, %v276_v6  ;;  %v1032_v10 = vpop.f32.mrb[3].mxu0 }
 0x14c   : > { %406 = vrot.lane.b32.xlu1 %v1628_v9, %s1395_s18  ;;  %285 = vrot.lane.b32.xlu0 %v1628_v9, %s1396_s20  ;;  %s1002_s18 = sshll.u32 %s1452_s16, 8  ;;  %s1314_s16 = scalar_lea.vmem %s1709_s30, 256 }
 0x14d   : > { %p1315_p11 = scmp.ne.s32.totalorder %s1709_s30, %s1314_s16 }
 0x14f   : > { %p1316_p1 = pnand %p1315_p11, %p1778_p0 }
 0x150   : > { %529 = vrot.lane.b32.xlu1 %v1628_v9, %s1397_s17  ;;  %408 = vrot.lane.b32.xlu0 %v1628_v9, %s1398_s24  ;;  %s1715_s24 = scalar_lea.hbm %s1764_s3, %s1002_s18 }
 0x151   : > { %p1317_p3 = pneg %p1316_p1 }
 0x154   : > { %650 = vrot.lane.b32.xlu1 %v1628_v9, %s1399_s26  ;;  %527 = vrot.lane.b32.xlu0 %v1628_v9, %s1400_s27  ;;  %s1409_s26 = smov [#allocation8]  }
 0x155   : > { %s1318_s27 = sshll.u32 %s1409_s26, 4  ;;  %s1319_s27 = int_to_ptr.vmem [resolvable:$false] %s1318_s27 }
 0x156   : > { %p1321_p7 = scmp.lt.s32.totalorder %s1709_s30, %s1319_s27 }
 0x158   : > { %648 = vrot.lane.b32.xlu0 %v1628_v9, %s1401_s23  ;;  %s1320_s23 = scalar_lea.vmem %s1319_s27, 512 }
 0x159   : > { %p1322_p9 = scmp.lt.s32.totalorder %s1320_s23, %s1314_s16 }
 0x15b   : > { %p1323_p12 = por %p1322_p9, %p1321_p7 }
 0x15d   : > { %p1324_p2 = pnand %p1323_p12, %p1317_p3 }
 0x1be   : > { %v286_v11 = vpop.permute.xlu0 %285  ;;  %v407_v14 = vpop.permute.xlu1 %406 }
 0x1bf   : > { %v292_v12 = vsel %vm287_vm2, %v286_v11, 0 }
 0x1c0   : > { %1034 = vmatpush3.bf16.xpose.msra.mxu1 %v292_v12 }
 0x1c1   : > { %1045 = vmatprep.subr.bf16.mxu1 %v1393_v0 }
 0x1c2   : > { %v409_v13 = vpop.permute.xlu0 %408  ;;  %v530_v16 = vpop.permute.xlu1 %529 }
 0x1c3   : > { %v414_v15 = vsel %vm287_vm2, %v409_v13, 0  ;;  %v535_v17 = vsel %vm287_vm2, %v530_v16, 0 }
 0x1c6   : > { %v651_v18 = vpop.permute.xlu1 %650  ;;  %v528_v19 = vpop.permute.xlu0 %527 }
 0x1c7   : > { %1036 = vmatmul.mubr.msk.bf16.vlgmr.msra.gmra.mrb[0].mxu1 %vm287_vm2, %v1628_v9  ;;  %v656_v20 = vsel %vm287_vm2, %v651_v18, 0 }
 0x1c8   : > { %1046 = vmatpush3.bf16.xpose.msra.mxu1 %v414_v15  ;;  %1047 = vmatprep.mubr.msk.bf16.mxu1 %vm1394_vm0, %v1393_v0 }
 0x1c9   : > { %1057 = vmatprep.subr.bf16.mxu1 %v1393_v0 }
 0x1ca   : > { %v649_v21 = vpop.permute.xlu0 %648 }
 0x1cf   : > { %1048 = vmatmul.mubr.msk.bf16.vlgmr.msra.gmra.mrb[4].mxu1 %vm287_vm2, %v407_v14 }
 0x1d0   : > { %1058 = vmatpush3.bf16.xpose.msra.mxu1 %v535_v17  ;;  %1059 = vmatprep.mubr.msk.bf16.mxu1 %vm1394_vm0, %v1393_v0 }
 0x1d1   : > { %1069 = vmatprep.subr.bf16.mxu1 %v1393_v0 }
 0x1d7   : > { %1060 = vmatmul.mubr.msk.bf16.vlgmr.msra.gmra.mrb[8].mxu1 %vm287_vm2, %v528_v19 }
 0x1d8   : > { %1070 = vmatpush3.bf16.xpose.msra.mxu1 %v656_v20  ;;  %1071 = vmatprep.mubr.msk.bf16.mxu1 %vm1394_vm0, %v1393_v0 }
 0x1d9   : > { %1081 = vmatprep.subr.bf16.mxu1 %v1393_v0 }
 0x1df   : > { %1072 = vmatmul.mubr.msk.bf16.vlgmr.msra.gmra.mrb[12].mxu1 %vm287_vm2, %v649_v21 }
 0x1e0   : > { %1085 = vmatprep.mubr.msk.bf16.mxu1 %vm1394_vm0, %v1393_v0 }
 0x29a   : > { %v328_v22 = vpop.f32.mrb[0].mxu1 }
 0x29b   : > { %v1037_v23 = vpop.f32.mrb[1].mxu1  ;;  %v336_v24 = vsel %vm335_vm3, %v328_v22, -inf }
 0x29c   : > { %337 = vmax.xlane.f32.xlu1 %v336_v24  ;;  %v331_v25 = vpop.f32.mrb[2].mxu1 }
 0x29d   : > { %v1038_v26 = vpop.f32.mrb[3].mxu1  ;;  %v339_v27 = vsel %vm335_vm3, %v331_v25, -inf }
 0x29e   : > { %340 = vmax.xlane.f32.xlu0 %v339_v27 }
 0x2a2   : > { %v450_v28 = vpop.f32.mrb[4].mxu1 }
 0x2a3   : > { %v1049_v29 = vpop.f32.mrb[5].mxu1  ;;  %v457_v30 = vsel %vm335_vm3, %v450_v28, -inf }
 0x2a4   : > { %458 = vmax.xlane.f32.xlu0 %v457_v30  ;;  %v453_v31 = vpop.f32.mrb[6].mxu1 }
 0x2a5   : > { %v1050_v32 = vpop.f32.mrb[7].mxu1  ;;  %v460_v33 = vsel %vm335_vm3, %v453_v31, -inf }
 0x2a6   : > { %461 = vmax.xlane.f32.xlu1 %v460_v33 }
 0x2aa   : > { %v571_v34 = vpop.f32.mrb[8].mxu1 }
 0x2ab   : > { %v1061_v35 = vpop.f32.mrb[9].mxu1  ;;  %v578_v36 = vsel %vm335_vm3, %v571_v34, -inf }
 0x2ac   : > { %579 = vmax.xlane.f32.xlu0 %v578_v36  ;;  %v574_v37 = vpop.f32.mrb[10].mxu1 }
 0x2ad   : > { %v1062_v38 = vpop.f32.mrb[11].mxu1  ;;  %v581_v39 = vsel %vm335_vm3, %v574_v37, -inf }
 0x2ae   : > { %582 = vmax.xlane.f32.xlu1 %v581_v39 }
 0x2b2   : > { %v692_v40 = vpop.f32.mrb[12].mxu1 }
 0x2b3   : > { %v1073_v41 = vpop.f32.mrb[13].mxu1  ;;  %v699_v42 = vsel %vm335_vm3, %v692_v40, -inf }
 0x2b4   : > { %700 = vmax.xlane.f32.xlu0 %v699_v42  ;;  %v695_v43 = vpop.f32.mrb[14].mxu1 }
 0x2b5   : > { %v1074_v44 = vpop.f32.mrb[15].mxu1  ;;  %v702_v45 = vsel %vm335_vm3, %v695_v43, -inf }
 0x2b6   : > { %703 = vmax.xlane.f32.xlu1 %v702_v45 }
 0x329   : > { %v338_v46 = vpop.xlane.xlu1 %337 }
 0x32a   : > { %v342_v47 = vsub.f32 %v328_v22, %v338_v46 }
 0x32b   : > { %v341_v48 = vpop.xlane.xlu0 %340 }
 0x32c   : > { %v344_v49 = vmul.f32 1.442695, %v342_v47  ;;  %v343_v50 = vsub.f32 %v331_v25, %v341_v48 }
 0x32e   : > { %1196 = vpow2.f32 %v344_v49  ;;  %v346_v51 = vmul.f32 1.442695, %v343_v50 }
 0x330   : > { %1198 = vpow2.f32 %v346_v51 }
 0x331   : > { %v459_v52 = vpop.xlane.xlu0 %458 }
 0x332   : > { %v463_v53 = vsub.f32 %v450_v28, %v459_v52 }
 0x333   : > { %v462_v61 = vpop.xlane.xlu1 %461 }
 0x334   : > { %v465_v54 = vmul.f32 1.442695, %v463_v53  ;;  %v464_v62 = vsub.f32 %v453_v31, %v462_v61 }
 0x336   : > { %1200 = vpow2.f32 %v465_v54  ;;  %v467_v2 = vmul.f32 1.442695, %v464_v62  ;;  %v1194_v62 = vld [vmem:[#allocation7] sm:$0xff]  }
 0x337   : > { %1082 = vmatpush3.bf16.msra.mxu1 %v1194_v62 }
 0x338   : > { %v1197_v55 = vpop.eup %1196  ;;  %1202 = vpow2.f32 %v467_v2  ;;  %1083 = vmatprep.subr.bf16.mxu1 %v1393_v0 }
 0x339   : > { %v348_v56 = vsel %vm335_vm3, %v1197_v55, 0.0  ;;  %v580_v1 = vpop.xlane.xlu0 %579 }
 0x33a   : > { %v1199_v57 = vpop.eup %1198  ;;  %349 = vadd.xlane.f32.xlu0 %v348_v56  ;;  %v584_v5 = vsub.f32 %v571_v34, %v580_v1 }
 0x33b   : > { %v351_v58 = vsel %vm335_vm3, %v1199_v57, 0.0  ;;  %v583_v63 = vpop.xlane.xlu1 %582 }
 0x33c   : > { %352 = vadd.xlane.f32.xlu1 %v351_v58  ;;  %v585_v3 = vsub.f32 %v574_v37, %v583_v63  ;;  %v586_v10 = vmul.f32 1.442695, %v584_v5 }
 0x33e   : > { %v588_v7 = vmul.f32 1.442695, %v585_v3 }
 0x340   : > { %v1668_v59 = vpop.eup %1200  ;;  %1204 = vpow2.f32 %v588_v7 }
 0x341   : > { %v469_v60 = vsel %vm335_vm3, %v1668_v59, 0.0  ;;  %v701_v6 = vpop.xlane.xlu0 %700  ;;  %1206 = vpow2.f32 %v586_v10 }
 0x342   : > { %470 = vadd.xlane.f32.xlu0 %v469_v60  ;;  %v705_v11 = vsub.f32 %v692_v40, %v701_v6  ;;  %v1203_v14 = vpop.eup %1202 }
 0x343   : > { %v704_v4 = vpop.xlane.xlu1 %703  ;;  %v472_v15 = vsel %vm335_vm3, %v1203_v14, 0.0 }
 0x344   : > { %v706_v8 = vsub.f32 %v695_v43, %v704_v4  ;;  %v707_v13 = vmul.f32 1.442695, %v705_v11  ;;  %v1195_v4 = vld [vmem:[#allocation7 + $0x8] sm:$0xff]  }
 0x345   : > { %1084 = vmatpush3.bf16.msra.mxu1 %v1195_v4 }
 0x346   : > { %v709_v12 = vmul.f32 1.442695, %v706_v8 }
 0x348   : > { %1208 = vpow2.f32 %v709_v12 }
 0x349   : > { %1210 = vpow2.f32 %v707_v13 }
 0x34a   : > { %v1205_v16 = vpop.eup %1204 }
 0x34b   : > { %v1207_v17 = vpop.eup %1206  ;;  %v593_v18 = vsel %vm335_vm3, %v1205_v16, 0.0 }
 0x34c   : > { %v590_v20 = vsel %vm335_vm3, %v1207_v17, 0.0 }
 0x34d   : > { %480 = vrot.lane.b32.xlu1 %v1628_v9, %s1402_s5 }
 0x352   : > { %v1676_v19 = vpop.eup %1208 }
 0x353   : > { %v1211_v21 = vpop.eup %1210  ;;  %v714_v22 = vsel %vm335_vm3, %v1676_v19, 0.0 }
 0x354   : > { %v711_v23 = vsel %vm335_vm3, %v1211_v21, 0.0 }
 0x358   : > { %359 = vrot.lane.b32.xlu0 %v1628_v9, %s1403_s10 }
 0x371   : > { %473 = vadd.xlane.f32.xlu1 %v472_v15 }
 0x375   : > { %594 = vadd.xlane.f32.xlu1 %v593_v18 }
 0x377   : > { %591 = vadd.xlane.f32.xlu0 %v590_v20 }
 0x379   : > { %715 = vadd.xlane.f32.xlu1 %v714_v22 }
 0x37b   : > { %712 = vadd.xlane.f32.xlu0 %v711_v23 }
 0x38a   : > { %601 = vrot.lane.b32.xlu1 %v1628_v9, %s1404_s11 }
 0x391   : > { %722 = vrot.lane.b32.xlu0 %v1628_v9, %s1405_s25 }
 0x3c7   : > { %v350_v24 = vpop.xlane.xlu0 %349 }
 0x3c8   : > { %1212 = vrcp.f32 %v350_v24 }
 0x3c9   : > { %v353_v25 = vpop.xlane.xlu1 %352 }
 0x3ca   : > { %1214 = vrcp.f32 %v353_v25 }
 0x3cd   : > { %v481_v33 = vpop.permute.xlu1 %480 }
 0x3cf   : > { %v471_v26 = vpop.xlane.xlu0 %470 }
 0x3d0   : > { %1216 = vrcp.f32 %v471_v26 }
 0x3d2   : > { %v1213_v27 = vpop.eup %1212 }
 0x3d3   : > { %v360_v28 = vpop.permute.xlu0 %359  ;;  %v356_v30 = vmul.f32 %v1213_v27, %v1197_v55 }
 0x3d4   : > { %v1215_v29 = vpop.eup %1214  ;;  %1040 = vmatpush3.bf16.msra.mxu0 %v360_v28 }
 0x3d5   : > { %v357_v31 = vmul.f32 %v1215_v29, %v1199_v57  ;;  %1051 = vmatprep.subr.bf16.mxu0 %v1393_v0 }
 0x3d7   : > { %v358_v32 = vpack.c.bf16 %v357_v31, %v356_v30 }
 0x3d9   : > { %1042 = vmatmul.mubr.msk.bf16.vlgmr.msra.gmra.mrb[4].mxu0 %vm335_vm3, %v358_v32 }
 0x3da   : > { %1052 = vmatpush3.bf16.msra.mxu0 %v481_v33  ;;  %1053 = vmatprep.mubr.msk.bf16.mxu0 %vm1394_vm0, %v1393_v0  ;;  %v1217_v36 = vpop.eup %1216 }
 0x3db   : > { %1063 = vmatprep.subr.bf16.mxu0 %v1393_v0  ;;  %v477_v40 = vmul.f32 %v1217_v36, %v1668_v59 }
 0x3fe   : > { %v474_v9 = vpop.xlane.xlu1 %473 }
 0x3ff   : > { %1218 = vrcp.f32 %v474_v9 }
 0x402   : > { %v595_v34 = vpop.xlane.xlu1 %594 }
 0x403   : > { %1220 = vrcp.f32 %v595_v34 }
 0x404   : > { %v592_v35 = vpop.xlane.xlu0 %591 }
 0x405   : > { %1222 = vrcp.f32 %v592_v35 }
 0x406   : > { %v716_v37 = vpop.xlane.xlu1 %715 }
 0x408   : > { %v713_v38 = vpop.xlane.xlu0 %712 }
 0x409   : > { %v1219_v39 = vpop.eup %1218  ;;  %1224 = vrcp.f32 %v713_v38 }
 0x40a   : > { %v478_v41 = vmul.f32 %v1219_v39, %v1203_v14  ;;  %1226 = vrcp.f32 %v716_v37  ;;  %v602_v44 = vpop.permute.xlu1 %601 }
 0x40c   : > { %v479_v42 = vpack.c.bf16 %v478_v41, %v477_v40  ;;  %v723_v50 = vpop.permute.xlu0 %722 }
 0x40d   : > { %v1221_v43 = vpop.eup %1220 }
 0x40e   : > { %1054 = vmatmul.mubr.msk.bf16.vlgmr.msra.gmra.mrb[8].mxu0 %vm335_vm3, %v479_v42  ;;  %v599_v47 = vmul.f32 %v1221_v43, %v1205_v16 }
 0x40f   : > { %v1223_v45 = vpop.eup %1222  ;;  %1064 = vmatpush3.bf16.msra.mxu0 %v602_v44  ;;  %1065 = vmatprep.mubr.msk.bf16.mxu0 %vm1394_vm0, %v1393_v0 }
 0x410   : > { %v598_v46 = vmul.f32 %v1223_v45, %v1207_v17  ;;  %1075 = vmatprep.subr.bf16.mxu0 %v1393_v0 }
 0x412   : > { %v600_v48 = vpack.c.bf16 %v599_v47, %v598_v46 }
 0x413   : > { %v1225_v49 = vpop.eup %1224 }
 0x414   : > { %v1227_v51 = vpop.eup %1226  ;;  %v719_v52 = vmul.f32 %v1225_v49, %v1211_v21 }
 0x415   : > { %v720_v53 = vmul.f32 %v1227_v51, %v1676_v19 }
 0x416   : > { %1066 = vmatmul.mubr.msk.bf16.vlgmr.msra.gmra.mrb[12].mxu0 %vm335_vm3, %v600_v48 }
 0x417   : > { %1076 = vmatpush3.bf16.msra.mxu0 %v723_v50  ;;  %1077 = vmatprep.mubr.msk.bf16.mxu0 %vm1394_vm0, %v1393_v0  ;;  %v721_v54 = vpack.c.bf16 %v720_v53, %v719_v52 }
 0x41e   : > { %1078 = vmatmul.mubr.msk.bf16.vlgmr.msra.gmra.mrb[16].mxu0 %vm335_vm3, %v721_v54 }
 0x4ac   : > { %v399_v55 = vpop.f32.mrb[4].mxu0 }
 0x4ad   : > { %v1043_v56 = vpop.f32.mrb[5].mxu0 }
 0x4ae   : > { %v402_v57 = vpop.f32.mrb[6].mxu0 }
 0x4af   : > { %v1044_v58 = vpop.f32.mrb[7].mxu0 }
 0x4e1   : > { %v520_v59 = vpop.f32.mrb[8].mxu0 }
 0x4e2   : > { %v1055_v60 = vpop.f32.mrb[9].mxu0 }
 0x4e3   : > { %v523_v61 = vpop.f32.mrb[10].mxu0 }
 0x4e4   : > { %v1177_v63 = vpack.i.bf16 %v523_v61, %v520_v59  ;;  %v1056_v1 = vpop.f32.mrb[11].mxu0 }
 0x4e6   : > { %1178 = vrot.lane.b32.xlu1 %v1177_v63, %s1406_s7 }
 0x4e9   : > { %v641_v2 = vpop.f32.mrb[12].mxu0 }
 0x4ea   : > { %v1067_v3 = vpop.f32.mrb[13].mxu0 }
 0x4eb   : > { %v644_v5 = vpop.f32.mrb[14].mxu0 }
 0x4ec   : > { %v1182_v6 = vpack.i.bf16 %v644_v5, %v641_v2  ;;  %v1068_v7 = vpop.f32.mrb[15].mxu0 }
 0x4ee   : > { %1183 = vrot.lane.b32.xlu0 %v1182_v6, %s1407_s8 }
 0x4f1   : > { %v762_v8 = vpop.f32.mrb[16].mxu0 }
 0x4f2   : > { %v1079_v10 = vpop.f32.mrb[17].mxu0 }
 0x4f3   : > { %v765_v11 = vpop.f32.mrb[18].mxu0 }
 0x4f4   : > { %v1187_v12 = vpack.i.bf16 %v765_v11, %v762_v8  ;;  %v1080_v13 = vpop.f32.mrb[19].mxu0 }
 0x4f6   : > { %1188 = vrot.lane.b32.xlu1 %v1187_v12, %s1408_s21 }
 0x558   : > { %v1179_v14 = vpop.permute.xlu1 %1178 }
 0x559   : > { %v1181_v16 = vunpack.i.h.bf16 %v1179_v14  ;;  %v1180_v0 = vunpack.i.l.bf16 %v1179_v14 }
 0x55b   : > { %v794_v20 = vsel %vm287_vm2, %v402_v57, %v1181_v16  ;;  %v793_v21 = vsel %vm287_vm2, %v399_v55, %v1180_v0 }
 0x560   : > { %v1184_v15 = vpop.permute.xlu0 %1183 }
 0x561   : > { %v1186_v17 = vunpack.i.h.bf16 %v1184_v15  ;;  %v1185_v18 = vunpack.i.l.bf16 %v1184_v15 }
 0x563   : > { %v796_v24 = vsel %vm335_vm3, %v794_v20, %v1186_v17  ;;  %v795_v25 = vsel %vm335_vm3, %v793_v21, %v1185_v18 }
 0x568   : > { %v1189_v19 = vpop.permute.xlu1 %1188 }
 0x569   : > { %v1191_v22 = vunpack.i.h.bf16 %v1189_v19  ;;  %v1190_v23 = vunpack.i.l.bf16 %v1189_v19 }
 0x56b   : > { %v799_v26 = vsel %vm797_vm4, %v796_v24, %v1191_v22  ;;  %v798_v27 = vsel %vm797_vm4, %v795_v25, %v1190_v23 }
 0x56c   : > { %v800_v28 = vpack.c.bf16 %v799_v26, %v798_v27 }
 0x56e   : > { %1086 = vmatmul.mubr.msk.bf16.vlgmr.msra.gmra.mrb[16].mxu1 %vm238_vm1, %v800_v28 }
 0x641   : > { %v854_v29 = vpop.f32.mrb[16].mxu1 }
 0x642   : > { %861 = vst.msk [vmem:[%s217_s29] sm:$0xff] %vm238_vm1, %v854_v29  ;;  %v1087_v30 = vpop.f32.mrb[17].mxu1 }
 0x643   : > { %v857_v31 = vpop.f32.mrb[18].mxu1 }
 0x644   : > { %862 = vst.msk [vmem:[%s217_s29 + $0x8] sm:$0xff] %vm238_vm1, %v857_v31  ;;  %v1088_v32 = vpop.f32.mrb[19].mxu1 }
 0x645   : > { %1327 = shalt.err (!%p1324_p2)
}
 0x646   : > { %s1328_s5 = scalar_lea.hbm %s1715_s24, 256  ;;  %s1332_s25 = scalar_lea.hbm %s1764_s3, 512 }
 0x647   : > { %p1329_p13 = scmp.ne.s32.totalorder %s1715_s24, %s1328_s5  ;;  %p1333_p4 = scmp.lt.u32.totalorder %s1715_s24, %s1764_s3 }
 0x648   : > { %p1334_p5 = scmp.lt.u32.totalorder %s1332_s25, %s1328_s5  ;;  %p1336_p11 = scmp.lt.u32.totalorder %s1328_s5, %s1715_s24 }
 0x649   : > { %p1330_p6 = pnand %p1329_p13, %p1778_p0 }
 0x64a   : > { %p1335_p8 = por %p1334_p5, %p1333_p4 }
 0x64b   : > { %p1331_p10 = pneg %p1330_p6 }
 0x64c   : > { %p1337_p1 = por %p1336_p11, %p1335_p8 }
 0x64e   : > { %p1338_p3 = pnand %p1337_p1, %p1331_p10 }
 0x650   : > { %1341 = shalt.err (!%p1338_p3)
}
 0x651   : > { %s1410_s29 = smov 128  }
 0x652   : > { %1099 = dma.vmem_to_hbm [thread:$0]  (%p1778_p0), %s1709_s30, 256, %s1715_s24, %s864_s22, %s1410_s29, %s1410_s29, %s1406_s7  }
 0x653 PF: > { %s892_s18 = sand.u32 1, %s1372_s12   ;;  %p1779_p7 = scmp.ne.s32.totalorder %s1769_s19, 0 }
 0x654   : > { %p1780_p9 = scmp.ge.s32.totalorder %s1384_s15, 2  ;;  %s893_s20 = scalar_lea.sflag [#allocation4], %s892_s18 }
 0x656   : > { %p1113_p12 = pnand %p1780_p9, %p1779_p7 }
 0x658   : > { %1367 = dma.done.wait (!%p1113_p12), %s893_s20, 256  }
 0x659   : > { %1369 = vsyncadd (!%p1113_p12), %s893_s20, 4294967040  ;;  %p17_p2 = scmp.ge.s32.totalorder %s1541_s4, 4   ;;  %s1781_s12 = smov %s1376_s13 }
 0x65a   : > { %s1782_s13 = smov %s1380_s14  ;;  %s1783_s14 = smov %s1557_s9 }
 0x65b   : > { %s1784_s15 = smov %s1541_s4  ;;  %19 = sbr.rel (!%p17_p2) target bundleno = 6 (0x6), region = 85 }
 0x662   :  { %898 = vsyncpa [#allocation3], 1 }
 0x663   :  { %900 = vsyncpa [#allocation3 + $0x1], 1 }
 0x664   :  { %901 = vsyncpa [#allocation6], 1 }
 0x665   :  { %902 = vsyncpa [#allocation4], 1 }
 0x666   :  { %904 = vsyncpa [#allocation4 + $0x1], 1 }

</bundles_post_ra>
